<compile_context>
chip_gen: v5e
topology: v5e:2x2
jax: 0.10.0
libtpu: 0.0.40
codegen_flags: <defaults>
</compile_context>

<pallas_src>
import jax
import jax.numpy as jnp
from jax import lax
from jax.experimental import pallas as pl
from jax.experimental.pallas import tpu as pltpu


def _round_up(n, m):
    return ((n + m - 1) // m) * m


# ----------------------------- Pallas kernel --------------------------------


def bilstm_chunk_kernel(gx_f_ref, gx_b_ref, wblk_ref, out_f_ref, out_b_ref,
                        h_scr, c_scr):
    """One time-chunk of the bidirectional LSTM recurrence.

    gx_f_ref : (C, Bp, 4Hp) precomputed x@W_ih + b for the FORWARD direction,
               gate columns ordered [i, f, o, g] (each gate zero-padded to Hp lanes).
    gx_b_ref : (C, Bp, 4Hp) same for the BACKWARD direction; the BlockSpec hands us
               time chunks in reverse chunk order, we walk inside the chunk backwards.
    wblk_ref : (2Hp, 8Hp) block-diagonal recurrent weight [Wf 0; 0 Wb] so one K=2Hp
               matmul serves both directions.
    out_*_ref: (C, Bp, Hp) per-direction hidden outputs for this chunk.
    h_scr/c_scr : (Bp, 2Hp) f32 state carried across grid iterations, [fwd | bwd].
    """
    C, Bp, Hp4 = gx_f_ref.shape
    Hp = Hp4 // 4

    @pl.when(pl.program_id(0) == 0)
    def _():
        h_scr[...] = jnp.zeros_like(h_scr)     # PyTorch default h0 = c0 = 0
        c_scr[...] = jnp.zeros_like(c_scr)

    def step(s, carry):
        h_f, c_f, h_b, c_b = carry             # (Bp, Hp) f32 each
        t_f = s                                # forward local time
        t_b = C - 1 - s                        # backward local time

        # Single fused block-diagonal recurrent matmul; RHS streamed from the VMEM
        # ref (no SSA weight hoist -> no spill), K = 2Hp.
        h_cat = jnp.concatenate([h_f, h_b], axis=-1)                   # (Bp, 2Hp)
        rec = jnp.dot(h_cat.astype(wblk_ref.dtype), wblk_ref[...],
                      preferred_element_type=jnp.float32)               # (Bp, 8Hp)

        # Each direction only loads the gate half it uses.
        gates_f = gx_f_ref[t_f].astype(jnp.float32) + rec[:, 0:4 * Hp]
        gates_b = gx_b_ref[t_b].astype(jnp.float32) + rec[:, 4 * Hp:8 * Hp]

        # Gate order [i, f, o | g]: one sigmoid over (Bp, 3Hp), one tanh over
        # (Bp, Hp) per direction (fewer, larger EUP pushes). Elementwise stays f32
        # (safe on v5e which has no bf16 VPU/EUP).
        sig_f = jax.nn.sigmoid(gates_f[:, 0:3 * Hp])
        sig_b = jax.nn.sigmoid(gates_b[:, 0:3 * Hp])
        g_f = jnp.tanh(gates_f[:, 3 * Hp:4 * Hp])
        g_b = jnp.tanh(gates_b[:, 3 * Hp:4 * Hp])

        c_f = sig_f[:, Hp:2 * Hp] * c_f + sig_f[:, 0:Hp] * g_f
        c_b = sig_b[:, Hp:2 * Hp] * c_b + sig_b[:, 0:Hp] * g_b
        h_f = sig_f[:, 2 * Hp:3 * Hp] * jnp.tanh(c_f)
        h_b = sig_b[:, 2 * Hp:3 * Hp] * jnp.tanh(c_b)

        out_f_ref[t_f] = h_f.astype(out_f_ref.dtype)
        out_b_ref[t_b] = h_b.astype(out_b_ref.dtype)
        return (h_f, c_f, h_b, c_b)

    carry0 = (h_scr[:, 0:Hp], c_scr[:, 0:Hp],
              h_scr[:, Hp:2 * Hp], c_scr[:, Hp:2 * Hp])
    h_f, c_f, h_b, c_b = lax.fori_loop(0, C, step, carry0)

    # persist state for the next time chunk
    h_scr[...] = jnp.concatenate([h_f, h_b], axis=-1)
    c_scr[...] = jnp.concatenate([c_f, c_b], axis=-1)


# ------------------------------ wrapper --------------------------------------


def _pack_gates_cols(w, H, Hp):
    """Reorder PyTorch gate blocks [i,f,g,o] -> [i,f,o,g]; zero-pad each gate to Hp."""
    rows = w.shape[0]
    w4 = w.reshape(rows, 4, H)[:, (0, 1, 3, 2), :]
    w4 = jnp.pad(w4, ((0, 0), (0, 0), (0, Hp - H)))
    return w4.reshape(rows, 4 * Hp)


def _prepare_weights(params, H, Hp, compute_dtype):
    wih_f = _pack_gates_cols(params["wih_f"], H, Hp)               # (D, 4Hp)
    wih_b = _pack_gates_cols(params["wih_b"], H, Hp)               # (D, 4Hp)
    b_f = _pack_gates_cols(params["b_f"], H, Hp)                   # (1, 4Hp)
    b_b = _pack_gates_cols(params["b_b"], H, Hp)                   # (1, 4Hp)

    def pad_rows(w):
        return jnp.pad(w, ((0, Hp - H), (0, 0)))                   # (Hp, 4Hp)

    whh_f = pad_rows(_pack_gates_cols(params["whh_f"], H, Hp))
    whh_b = pad_rows(_pack_gates_cols(params["whh_b"], H, Hp))
    w_blk = jnp.zeros((2 * Hp, 8 * Hp), jnp.float32)
    w_blk = w_blk.at[:Hp, :4 * Hp].set(whh_f).at[Hp:, 4 * Hp:].set(whh_b)
    return wih_f, wih_b, b_f, b_b, w_blk.astype(compute_dtype)


def _vmem_need(chunk, Bp, Hp, gx_bytes, out_bytes):
    gx = 2 * 2 * chunk * Bp * 4 * Hp * gx_bytes     # 2 directions, double-buffered
    out = 2 * 2 * chunk * Bp * Hp * out_bytes
    w = 2 * (2 * Hp) * (8 * Hp) * gx_bytes
    scr = 2 * Bp * 2 * Hp * 4
    return gx + out + w + scr


def bilstm_encoder(x, params, *, compute_dtype=jnp.bfloat16, max_chunk=None):
    """x: (B, T, D) batch_first like PyTorch. Returns (B, T, hidden_size).

    compute_dtype: dtype for gx storage and the recurrent-matmul operands
    (bf16 -> 2x MXU on all generations, half the gx footprint; elementwise/EUP path
    stays f32). Use jnp.float32 for bit-tight parity with the f32 PyTorch reference.
    """
    B, T, D = x.shape
    H = params["wih_f"].shape[1] // 4            # per-direction hidden = hidden_size // 2
    Hp = _round_up(H, 128)                       # lane-aligned per-direction hidden
    Bp = _round_up(B, 8)                         # sublane-aligned batch

    wih_f, wih_b, b_f, b_b, w_blk = _prepare_weights(params, H, Hp, compute_dtype)

    # ---- hoisted input projection: transpose the SMALL (T,B,D) tensor, not gx ----
    x_tbd = jnp.transpose(x, (1, 0, 2)).astype(jnp.float32)           # (T, B, D)
    x_tbd = jnp.pad(x_tbd, ((0, 0), (0, Bp - B), (0, 0)))             # (T, Bp, D)
    xf = x_tbd.reshape(T * Bp, D)
    gx_f = (xf @ wih_f + b_f).reshape(T, Bp, 4 * Hp).astype(compute_dtype)
    gx_b = (xf @ wih_b + b_b).reshape(T, Bp, 4 * Hp).astype(compute_dtype)

    out_dtype = x.dtype
    gx_bytes = jnp.dtype(compute_dtype).itemsize
    out_bytes = jnp.dtype(out_dtype).itemsize

    # ---- generation-aware VMEM budget & time-chunk streaming (no hard error) ----
    try:
        vmem_cap = pltpu.get_tpu_info().vmem_capacity_bytes
    except Exception:
        vmem_cap = 64 * 1024 * 1024                          # v7x per-TC floor
    budget = max(16 * 1024 * 1024, vmem_cap - 16 * 1024 * 1024)

    chunk = 1
    limit = max_chunk if max_chunk is not None else T
    for c in range(1, T + 1):
        # TODO(synk): support non-divisor chunk sizes (remainder masking) for prime T.
        if T % c == 0 and c <= limit and \
                _vmem_need(c, Bp, Hp, gx_bytes, out_bytes) <= budget // 2:
            chunk = c
    nT = T // chunk
    need = _vmem_need(chunk, Bp, Hp, gx_bytes, out_bytes)
    vmem_limit = int(min(budget, max(32 * 1024 * 1024, 2 * need)))

    grid_spec = pltpu.PrefetchScalarGridSpec(
        num_scalar_prefetch=0,
        grid=(nT,),
        in_specs=[
            pl.BlockSpec((chunk, Bp, 4 * Hp), lambda i: (i, 0, 0)),            # fwd gx
            pl.BlockSpec((chunk, Bp, 4 * Hp), lambda i: (nT - 1 - i, 0, 0)),   # bwd gx
            pl.BlockSpec((2 * Hp, 8 * Hp), lambda i: (0, 0)),                  # W_blk
        ],
        out_specs=[
            pl.BlockSpec((chunk, Bp, Hp), lambda i: (i, 0, 0)),                # fwd out
            pl.BlockSpec((chunk, Bp, Hp), lambda i: (nT - 1 - i, 0, 0)),       # bwd out
        ],
        scratch_shapes=[pltpu.VMEM((Bp, 2 * Hp), jnp.float32),
                        pltpu.VMEM((Bp, 2 * Hp), jnp.float32)],
    )

    out_f, out_b = pl.pallas_call(
        bilstm_chunk_kernel,
        out_shape=(jax.ShapeDtypeStruct((T, Bp, Hp), out_dtype),
                   jax.ShapeDtypeStruct((T, Bp, Hp), out_dtype)),
        grid_spec=grid_spec,
        compiler_params=pltpu.CompilerParams(
            dimension_semantics=("arbitrary",),        # serial carry through h/c scratch
            vmem_limit_bytes=vmem_limit),
    )(gx_f, gx_b, w_blk)

    # TODO(synk): on v7x, split the two directions across the 2 TensorCores
    #             (grid=(2, nT), dimension_semantics=("parallel","arbitrary")) for ~2x.
    # TODO(synk): (advanced, measure-first) hold W_blk in MXU weight registers across
    #             steps via pltpu.matmul_push_rhs / matmul_acc_lhs / matmul_pop.

    # single fused epilogue: drop B/H padding, merge directions, back to batch-major
    out = jnp.concatenate([out_f[:, :B, :H], out_b[:, :B, :H]], axis=-1)   # (T, B, 2H)
    return jnp.transpose(out, (1, 0, 2))                                   # (B, T, 2H)


# --------------------------- params & reference ------------------------------


def init_params(key, input_size, hidden_size):
    """Deterministic init matching PyTorch LSTM shapes.

    PyTorch stores weight_ih (4H, D), weight_hh (4H, H), bias_ih (4H,), bias_hh (4H,)
    per direction with gate order [i, f, g, o], init U(-1/sqrt(H), 1/sqrt(H)).
    We pre-transpose weights and fuse the two biases."""
    assert hidden_size % 2 == 0, "hidden_size must be even for the bidirectional split"
    H = hidden_size // 2
    bound = 1.0 / jnp.sqrt(H)
    keys = jax.random.split(key, 8)

    def u(k, shape):
        return jax.random.uniform(k, shape, jnp.float32, -bound, bound)

    params = {}
    for d, off in (("f", 0), ("b", 4)):
        w_ih = u(keys[off + 0], (4 * H, input_size))
        w_hh = u(keys[off + 1], (4 * H, H))
        b_ih = u(keys[off + 2], (4 * H,))
        b_hh = u(keys[off + 3], (4 * H,))
        params[f"wih_{d}"] = w_ih.T                         # (D, 4H)
        params[f"whh_{d}"] = w_hh.T                         # (H, 4H)
        params[f"b_{d}"] = (b_ih + b_hh).reshape(1, 4 * H)  # (1, 4H)
    return params


def _lstm_ref_single_dir(x, wih, whh, b, reverse):
    """Pure-JAX reference for one direction (PyTorch semantics, f32)."""
    B, T, D = x.shape
    H = wih.shape[1] // 4
    h = jnp.zeros((B, H), jnp.float32)
    c = jnp.zeros((B, H), jnp.float32)
    outs = [None] * T
    order = range(T - 1, -1, -1) if reverse else range(T)
    for t in order:
        gates = x[:, t, :] @ wih + h @ whh + b
        i = jax.nn.sigmoid(gates[:, 0 * H:1 * H])
        f = jax.nn.sigmoid(gates[:, 1 * H:2 * H])
        g = jnp.tanh(gates[:, 2 * H:3 * H])
        o = jax.nn.sigmoid(gates[:, 3 * H:4 * H])
        c = f * c + i * g
        h = o * jnp.tanh(c)
        outs[t] = h
    return jnp.stack(outs, axis=1)


if __name__ == "__main__":
    # shapes implied by forward(x): x is (batch, seq, input_size)
    batch, seq, input_size, hidden_size = 2, 8, 16, 32

    key = jax.random.PRNGKey(0)
    k_x, k_p = jax.random.split(key)
    x = jax.random.normal(k_x, (batch, seq, input_size), jnp.float32)
    params = init_params(k_p, input_size, hidden_size)

    # pure-JAX reference of PyTorch bidirectional LSTM forward
    ref_f = _lstm_ref_single_dir(x, params["wih_f"], params["whh_f"], params["b_f"], False)
    ref_b = _lstm_ref_single_dir(x, params["wih_b"], params["whh_b"], params["b_b"], True)
    ref = jnp.concatenate([ref_f, ref_b], axis=-1)

    # 1) f32 compute path (bit-tight vs. reference), single resident chunk
    out_f32 = jax.block_until_ready(bilstm_encoder(x, params, compute_dtype=jnp.float32))
    assert out_f32.shape == (batch, seq, hidden_size), out_f32.shape
    assert jnp.allclose(out_f32, ref, atol=1e-5, rtol=1e-5)

    # 2) f32 compute path with forced multi-chunk streaming (grid=(4,)) to exercise
    #    the cross-chunk h/c scratch carry and the reversed backward index map
    out_stream = jax.block_until_ready(
        bilstm_encoder(x, params, compute_dtype=jnp.float32, max_chunk=2))
    assert jnp.allclose(out_stream, ref, atol=1e-5, rtol=1e-5)

    # 3) default bf16 matmul / bf16 gx path (perf config) — looser tolerance
    out_bf16 = jax.block_until_ready(bilstm_encoder(x, params))
    assert out_bf16.shape == (batch, seq, hidden_size), out_bf16.shape
    assert jnp.allclose(out_bf16, ref, atol=3e-2, rtol=3e-2)

    print("KERNEL_OK")
</pallas_src>

<mosaic_0001>
module attributes {stable_mosaic.version = 11 : i64} {
  func.func @bilstm_chunk_kernel(%arg0: i32, %arg1: memref<8x8x512xf32, #tpu.memory_space<vmem>>, %arg2: memref<8x8x512xf32, #tpu.memory_space<vmem>>, %arg3: memref<256x1024xf32, #tpu.memory_space<vmem>>, %arg4: memref<8x8x128xf32, #tpu.memory_space<vmem>>, %arg5: memref<8x8x128xf32, #tpu.memory_space<vmem>>, %arg6: memref<8x256xf32, #tpu.memory_space<vmem>>, %arg7: memref<8x256xf32, #tpu.memory_space<vmem>>) attributes {dimension_semantics = [#tpu.dimension_semantics<arbitrary>], iteration_bounds = array<i64: 1>, scalar_prefetch = 0 : i64, scratch_operands = 2 : i64, tpu.core_type = #tpu.core_type<tc>, window_params = [{transform_indices = @transform_0, window_bounds = array<i64: 8, 8, 512>}, {transform_indices = @transform_1, window_bounds = array<i64: 8, 8, 512>}, {pipeline_mode = #tpu.pipeline_mode<synchronous>, transform_indices = @transform_2, window_bounds = array<i64: 256, 1024>}, {transform_indices = @transform_3, window_bounds = array<i64: 8, 8, 128>}, {transform_indices = @transform_4, window_bounds = array<i64: 8, 8, 128>}]} {
    %c0_i32 = arith.constant 0 : i32
    %0 = arith.cmpi eq, %arg0, %c0_i32 : i32
    %1 = arith.extui %0 : i1 to i32
    %c0_i32_0 = arith.constant 0 : i32
    %2 = arith.cmpi ne, %1, %c0_i32_0 : i32
    scf.if %2 {
      %cst = arith.constant 0.000000e+00 : f32
      %13 = vector.broadcast %cst : f32 to vector<8x256xf32>
      %c0_13 = arith.constant 0 : index
      %c0_14 = arith.constant 0 : index
      %14 = vector.load %arg6[%c0_13, %c0_14] : memref<8x256xf32, #tpu.memory_space<vmem>>, vector<8x256xf32>
      tpu.vector_store %arg6[%c0_13, %c0_14], %13 {strides = array<i32>} : memref<8x256xf32, #tpu.memory_space<vmem>>, vector<8x256xf32>,
      %cst_15 = arith.constant 0.000000e+00 : f32
      %15 = vector.broadcast %cst_15 : f32 to vector<8x256xf32>
      %c0_16 = arith.constant 0 : index
      %c0_17 = arith.constant 0 : index
      %16 = vector.load %arg7[%c0_16, %c0_17] : memref<8x256xf32, #tpu.memory_space<vmem>>, vector<8x256xf32>
      tpu.vector_store %arg7[%c0_16, %c0_17], %15 {strides = array<i32>} : memref<8x256xf32, #tpu.memory_space<vmem>>, vector<8x256xf32>,
    } else {
    }
    %c0 = arith.constant 0 : index
    %c0_1 = arith.constant 0 : index
    %3 = vector.load %arg6[%c0, %c0_1] : memref<8x256xf32, #tpu.memory_space<vmem>>, vector<8x128xf32>
    %c0_2 = arith.constant 0 : index
    %c0_3 = arith.constant 0 : index
    %4 = vector.load %arg7[%c0_2, %c0_3] : memref<8x256xf32, #tpu.memory_space<vmem>>, vector<8x128xf32>
    %c0_4 = arith.constant 0 : index
    %c128 = arith.constant 128 : index
    %5 = vector.load %arg6[%c0_4, %c128] : memref<8x256xf32, #tpu.memory_space<vmem>>, vector<8x128xf32>
    %c0_5 = arith.constant 0 : index
    %c128_6 = arith.constant 128 : index
    %6 = vector.load %arg7[%c0_5, %c128_6] : memref<8x256xf32, #tpu.memory_space<vmem>>, vector<8x128xf32>
    %c0_i32_7 = arith.constant 0 : i32
    %c8_i32 = arith.constant 8 : i32
    %7 = arith.addi %c0_i32_7, %c8_i32 : i32
    %c1_i32 = arith.constant 1 : i32
    %8:4 = scf.for %arg8 = %c0_i32_7 to %7 step %c1_i32 iter_args(%arg9 = %3, %arg10 = %4, %arg11 = %5, %arg12 = %6) -> (vector<8x128xf32>, vector<8x128xf32>, vector<8x128xf32>, vector<8x128xf32>)  : i32 {
      %c7_i32 = arith.constant 7 : i32
      %13 = arith.subi %c7_i32, %arg8 : i32
      %14 = tpu.concatenate %arg9, %arg11 in 1 : vector<8x128xf32>, vector<8x128xf32> -> vector<8x256xf32>
      %c0_13 = arith.constant 0 : index
      %c0_14 = arith.constant 0 : index
      %15 = vector.load %arg3[%c0_13, %c0_14] : memref<256x1024xf32, #tpu.memory_space<vmem>>, vector<256x1024xf32>
      %cst = arith.constant dense<0.000000e+00> : vector<8x1024xf32>
      %16 = tpu.matmul %14, %15, %cst {dimension_numbers = #tpu.dot_dimension_numbers<[1], [0], [0], [1], [0, 0, 1, 1], [], []>} : vector<8x256xf32>, vector<256x1024xf32>, vector<8x1024xf32> -> vector<8x1024xf32>
      %17 = arith.index_cast %arg8 : i32 to index
      %c0_15 = arith.constant 0 : index
      %c0_16 = arith.constant 0 : index
      %18 = vector.load %arg1[%17, %c0_15, %c0_16] : memref<8x8x512xf32, #tpu.memory_space<vmem>>, vector<1x8x512xf32>
      %19 = vector.shape_cast %18 : vector<1x8x512xf32> to vector<8x512xf32>
      %20 = vector.extract_strided_slice %16 {offsets = [0, 0], sizes = [8, 512], strides = [1, 1]} : vector<8x1024xf32> to vector<8x512xf32>
      %21 = arith.addf %19, %20 : vector<8x512xf32>
      %22 = arith.index_cast %13 : i32 to index
      %c0_17 = arith.constant 0 : index
      %c0_18 = arith.constant 0 : index
      %23 = vector.load %arg2[%22, %c0_17, %c0_18] : memref<8x8x512xf32, #tpu.memory_space<vmem>>, vector<1x8x512xf32>
      %24 = vector.shape_cast %23 : vector<1x8x512xf32> to vector<8x512xf32>
      %25 = vector.extract_strided_slice %16 {offsets = [0, 512], sizes = [8, 512], strides = [1, 1]} : vector<8x1024xf32> to vector<8x512xf32>
      %26 = arith.addf %24, %25 : vector<8x512xf32>
      %27 = vector.extract_strided_slice %21 {offsets = [0, 0], sizes = [8, 384], strides = [1, 1]} : vector<8x512xf32> to vector<8x384xf32>
      %28 = arith.negf %27 : vector<8x384xf32>
      %29 = math.exp %28 : vector<8x384xf32>
      %cst_19 = arith.constant 1.000000e+00 : f32
      %30 = vector.broadcast %cst_19 : f32 to vector<8x384xf32>
      %31 = arith.addf %30, %29 : vector<8x384xf32>
      %32 = arith.divf %30, %31 : vector<8x384xf32>
      %33 = vector.extract_strided_slice %26 {offsets = [0, 0], sizes = [8, 384], strides = [1, 1]} : vector<8x512xf32> to vector<8x384xf32>
      %34 = arith.negf %33 : vector<8x384xf32>
      %35 = math.exp %34 : vector<8x384xf32>
      %cst_20 = arith.constant 1.000000e+00 : f32
      %36 = vector.broadcast %cst_20 : f32 to vector<8x384xf32>
      %37 = arith.addf %36, %35 : vector<8x384xf32>
      %38 = arith.divf %36, %37 : vector<8x384xf32>
      %39 = vector.extract_strided_slice %21 {offsets = [0, 384], sizes = [8, 128], strides = [1, 1]} : vector<8x512xf32> to vector<8x128xf32>
      %40 = math.tanh %39 : vector<8x128xf32>
      %41 = vector.extract_strided_slice %26 {offsets = [0, 384], sizes = [8, 128], strides = [1, 1]} : vector<8x512xf32> to vector<8x128xf32>
      %42 = math.tanh %41 : vector<8x128xf32>
      %43 = vector.extract_strided_slice %32 {offsets = [0, 128], sizes = [8, 128], strides = [1, 1]} : vector<8x384xf32> to vector<8x128xf32>
      %44 = arith.mulf %43, %arg10 : vector<8x128xf32>
      %45 = vector.extract_strided_slice %32 {offsets = [0, 0], sizes = [8, 128], strides = [1, 1]} : vector<8x384xf32> to vector<8x128xf32>
      %46 = arith.mulf %45, %40 : vector<8x128xf32>
      %47 = arith.addf %44, %46 : vector<8x128xf32>
      %48 = vector.extract_strided_slice %38 {offsets = [0, 128], sizes = [8, 128], strides = [1, 1]} : vector<8x384xf32> to vector<8x128xf32>
      %49 = arith.mulf %48, %arg12 : vector<8x128xf32>
      %50 = vector.extract_strided_slice %38 {offsets = [0, 0], sizes = [8, 128], strides = [1, 1]} : vector<8x384xf32> to vector<8x128xf32>
      %51 = arith.mulf %50, %42 : vector<8x128xf32>
      %52 = arith.addf %49, %51 : vector<8x128xf32>
      %53 = vector.extract_strided_slice %32 {offsets = [0, 256], sizes = [8, 128], strides = [1, 1]} : vector<8x384xf32> to vector<8x128xf32>
      %54 = math.tanh %47 : vector<8x128xf32>
      %55 = arith.mulf %53, %54 : vector<8x128xf32>
      %56 = vector.extract_strided_slice %38 {offsets = [0, 256], sizes = [8, 128], strides = [1, 1]} : vector<8x384xf32> to vector<8x128xf32>
      %57 = math.tanh %52 : vector<8x128xf32>
      %58 = arith.mulf %56, %57 : vector<8x128xf32>
      %59 = arith.index_cast %arg8 : i32 to index
      %c0_21 = arith.constant 0 : index
      %c0_22 = arith.constant 0 : index
      %60 = vector.load %arg4[%59, %c0_21, %c0_22] : memref<8x8x128xf32, #tpu.memory_space<vmem>>, vector<1x8x128xf32>
      %61 = vector.shape_cast %60 : vector<1x8x128xf32> to vector<8x128xf32>
      %62 = vector.shape_cast %55 : vector<8x128xf32> to vector<1x8x128xf32>
      tpu.vector_store %arg4[%59, %c0_21, %c0_22], %62 {strides = array<i32>} : memref<8x8x128xf32, #tpu.memory_space<vmem>>, vector<1x8x128xf32>,
      %63 = arith.index_cast %13 : i32 to index
      %c0_23 = arith.constant 0 : index
      %c0_24 = arith.constant 0 : index
      %64 = vector.load %arg5[%63, %c0_23, %c0_24] : memref<8x8x128xf32, #tpu.memory_space<vmem>>, vector<1x8x128xf32>
      %65 = vector.shape_cast %64 : vector<1x8x128xf32> to vector<8x128xf32>
      %66 = vector.shape_cast %58 : vector<8x128xf32> to vector<1x8x128xf32>
      tpu.vector_store %arg5[%63, %c0_23, %c0_24], %66 {strides = array<i32>} : memref<8x8x128xf32, #tpu.memory_space<vmem>>, vector<1x8x128xf32>,
      scf.yield %55, %47, %58, %52 : vector<8x128xf32>, vector<8x128xf32>, vector<8x128xf32>, vector<8x128xf32>
    }
    %c8_i32_8 = arith.constant 8 : i32
    %9 = tpu.concatenate %8#0, %8#2 in 1 : vector<8x128xf32>, vector<8x128xf32> -> vector<8x256xf32>
    %c0_9 = arith.constant 0 : index
    %c0_10 = arith.constant 0 : index
    %10 = vector.load %arg6[%c0_9, %c0_10] : memref<8x256xf32, #tpu.memory_space<vmem>>, vector<8x256xf32>
    tpu.vector_store %arg6[%c0_9, %c0_10], %9 {strides = array<i32>} : memref<8x256xf32, #tpu.memory_space<vmem>>, vector<8x256xf32>,
    %11 = tpu.concatenate %8#1, %8#3 in 1 : vector<8x128xf32>, vector<8x128xf32> -> vector<8x256xf32>
    %c0_11 = arith.constant 0 : index
    %c0_12 = arith.constant 0 : index
    %12 = vector.load %arg7[%c0_11, %c0_12] : memref<8x256xf32, #tpu.memory_space<vmem>>, vector<8x256xf32>
    tpu.vector_store %arg7[%c0_11, %c0_12], %11 {strides = array<i32>} : memref<8x256xf32, #tpu.memory_space<vmem>>, vector<8x256xf32>,
    return
  }
  func.func @transform_0(%arg0: i32) -> (i32, i32, i32) {
    %c0_i32 = arith.constant 0 : i32
    %c0_i32_0 = arith.constant 0 : i32
    %c0_i32_1 = arith.constant 0 : i32
    return %arg0, %c0_i32, %c0_i32_0 : i32, i32, i32
  }
  func.func @transform_1(%arg0: i32) -> (i32, i32, i32) {
    %c0_i32 = arith.constant 0 : i32
    %0 = arith.subi %c0_i32, %arg0 : i32
    %c0_i32_0 = arith.constant 0 : i32
    %c0_i32_1 = arith.constant 0 : i32
    %c0_i32_2 = arith.constant 0 : i32
    return %0, %c0_i32_0, %c0_i32_1 : i32, i32, i32
  }
  func.func @transform_2(%arg0: i32) -> (i32, i32) {
    %c0_i32 = arith.constant 0 : i32
    %c0_i32_0 = arith.constant 0 : i32
    %c0_i32_1 = arith.constant 0 : i32
    return %c0_i32, %c0_i32_0 : i32, i32
  }
  func.func @transform_3(%arg0: i32) -> (i32, i32, i32) {
    %c0_i32 = arith.constant 0 : i32
    %c0_i32_0 = arith.constant 0 : i32
    %c0_i32_1 = arith.constant 0 : i32
    return %arg0, %c0_i32, %c0_i32_0 : i32, i32, i32
  }
  func.func @transform_4(%arg0: i32) -> (i32, i32, i32) {
    %c0_i32 = arith.constant 0 : i32
    %0 = arith.subi %c0_i32, %arg0 : i32
    %c0_i32_0 = arith.constant 0 : i32
    %c0_i32_1 = arith.constant 0 : i32
    %c0_i32_2 = arith.constant 0 : i32
    return %0, %c0_i32_0, %c0_i32_1 : i32, i32, i32
  }
}

</mosaic_0001>

<bundles_post_ra>
// kernel: tpu_custom_call.1
= control target key start
LH: loop header
LB: loop body
LE: loop exit
PB: predicated region body
PF: predicated region fallthrough
CT: control target
= control target key end

     0   :  { %10 = vsyncpa [#allocation5], 0  ;;  %s1307_s0 = inlined_call_operand.hbm [shape: f32[8,8,512], index: 0, kind: input, shape index: {}]   ;;  %s1308_s1 = inlined_call_operand.hbm [shape: f32[8,8,512], index: 1, kind: input, shape index: {}]   ;;  %s1309_s2 = inlined_call_operand.hbm [shape: f32[256,1024], index: 2, kind: input, shape index: {}]   ;;  %s1310_s3 = inlined_call_operand.hbm [shape: f32[8,8,128], index: 3, kind: output, shape index: {0}]   ;;  %s1311_s4 = inlined_call_operand.hbm [shape: f32[8,8,128], index: 4, kind: output, shape index: {1}]  }
   0x1   :  { %11 = vsyncpa [#allocation8], 0 }
   0x2   :  { %12 = vsyncpa [#allocation6], 0 }
   0x3   :  { %13 = vsyncpa [#allocation12], 0  ;;  %s36_s17 = sshll.u32 %s1308_s1, 4  ;;  %s1168_s18 = smov [#allocation7]   ;;  %s37_s17 = int_to_ptr.hbm [resolvable:$true] %s36_s17 }
   0x4   :  { %s38_s19 = sshll.u32 %s1168_s18, 4  ;;  %s18_s22 = sshll.u32 %s1307_s0, 4  ;;  %s39_s19 = int_to_ptr.vmem [resolvable:$true] %s38_s19  ;;  %s19_s22 = int_to_ptr.hbm [resolvable:$true] %s18_s22 }
   0x5   :  { %s1169_s23 = smov 512   ;;  %s1170_s24 = smov 32  }
   0x6   :  { %44 = dma.hbm_to_vmem [thread:$0]  %s37_s17, 4096, %s39_s19, [#allocation8], %s1169_s23, %s1169_s23, %s1170_s24  }
   0x7   :  { %s1171_s25 = smov [#allocation4]   ;;  %s49_s29 = sshll.u32 %s1309_s2, 4  ;;  %s50_s29 = int_to_ptr.hbm [resolvable:$true] %s49_s29 }
   0x8   :  { %s20_s26 = sshll.u32 %s1171_s25, 4  ;;  %s1172_s1 = smov [#allocation9]   ;;  %s21_s26 = int_to_ptr.vmem [resolvable:$true] %s20_s26 }
   0x9   :  { %26 = dma.hbm_to_vmem [thread:$0]  %s19_s22, 4096, %s21_s26, [#allocation5], %s1169_s23, %s1169_s23, %s1170_s24  }
   0xa   :  { %s51_s30 = sshll.u32 %s1172_s1, 4  ;;  %s1173_s5 = smov 1024   ;;  %s52_s30 = int_to_ptr.vmem [resolvable:$true] %s51_s30 }
   0xb   :  { %s1174_s6 = smov 64  }
   0xc   :  { %57 = dma.hbm_to_vmem [thread:$0]  %s50_s29, 32768, %s52_s30, [#allocation8], %s1173_s5, %s1173_s5, %s1174_s6  }
   0xd   :  { %1140 = dma.done.wait [#allocation5], 4096  }
   0xe   :  { %1141 = vsyncadd [#allocation5], 4294963200 }
   0xf   :  { %1142 = dma.done.wait [#allocation8], 36864  }
  0x10   :  { %1143 = vsyncadd [#allocation8], 4294930432  ;;  %v1213_v0 = vmov 0.0   ;;  %v1215_v1 = vmov 0.0   ;;  %v1217_v2 = vmov 0.0   ;;  %v1219_v3 = vmov 0.0  }
  0x11   :  { %s1221_s0 = smov 0  }
  0x12 LB: > { %v217_v4 = vld [vmem:[#allocation9 + $0x3c0] sm:$0xff]  ;;  %v218_v6 = vld [vmem:[#allocation9 + $0x3c8] sm:$0xff]  ;;  %s914_s2 = sshll.u32 %s1166_s0, 5  ;;  %s912_s8 = sshll.u32 %s1166_s0, 3  ;;  %s1166_s0 = sphi %s1221_s0, %s91_s0   ;;  %v1162_v3 = vphi %v1219_v3, %v1273_v3   ;;  %v1158_v2 = vphi %v1217_v2, %v1269_v2   ;;  %v1154_v1 = vphi %v1215_v1, %v820_v1   ;;  %v1150_v0 = vphi %v1213_v0, %v816_v0  }
  0x13   : > { %v345_v5 = vld [vmem:[#allocation9 + $0x7c0] sm:$0xff]  ;;  %353 = vmatpush.msra.mxu0 %v217_v4  ;;  %v346_v7 = vld [vmem:[#allocation9 + $0x7c8] sm:$0xff]  ;;  %393 = vmatpush.msra.mxu2 %v218_v6  ;;  %s1255_s7 = scalar_lea.vmem [#allocation4], %s914_s2  ;;  %s96_s9 = ssub.s32 7, %s1166_s0 }
  0x14   : > { %373 = vmatpush.msra.mxu1 %v345_v5  ;;  %v209_v8 = vld [vmem:[#allocation9 + $0x380] sm:$0xff]  ;;  %413 = vmatpush.msra.mxu3 %v346_v7  ;;  %v210_v10 = vld [vmem:[#allocation9 + $0x388] sm:$0xff]  ;;  %s822_s10 = scalar_lea.vmem [#allocation10], %s912_s8  ;;  %s915_s11 = sshll.u32 %s96_s9, 5 }
  0x15   : > { %v337_v9 = vld [vmem:[#allocation9 + $0x780] sm:$0xff]  ;;  %v338_v11 = vld [vmem:[#allocation9 + $0x788] sm:$0xff]  ;;  %354 = vmatpush.msra.mxu0 %v209_v8  ;;  %394 = vmatpush.msra.mxu2 %v210_v10  ;;  %v219_v8 = vld [vmem:[#allocation9 + $0x3d0] sm:$0xff]  ;;  %s1279_s12 = scalar_lea.vmem [#allocation7], %s915_s11  ;;  %s913_s13 = sshll.u32 %s96_s9, 3 }
  0x16   : > { %v201_v12 = vld [vmem:[#allocation9 + $0x340] sm:$0xff]  ;;  %374 = vmatpush.msra.mxu1 %v337_v9  ;;  %v202_v14 = vld [vmem:[#allocation9 + $0x348] sm:$0xff]  ;;  %414 = vmatpush.msra.mxu3 %v338_v11  ;;  %v347_v9 = vld [vmem:[#allocation9 + $0x7d0] sm:$0xff]  ;;  %s825_s14 = scalar_lea.vmem [#allocation11], %s913_s13  ;;  %s91_s0 = sadd.s32 1, %s1166_s0  }
  0x17   : > { %v329_v13 = vld [vmem:[#allocation9 + $0x740] sm:$0xff]  ;;  %v330_v15 = vld [vmem:[#allocation9 + $0x748] sm:$0xff]  ;;  %355 = vmatpush.msra.mxu0 %v201_v12  ;;  %395 = vmatpush.msra.mxu2 %v202_v14  ;;  %v220_v10 = vld [vmem:[#allocation9 + $0x3d8] sm:$0xff]  ;;  %p88_p0 = scmp.ge.s32.totalorder %s91_s0, 8  }
  0x18   : > { %v193_v16 = vld [vmem:[#allocation9 + $0x300] sm:$0xff]  ;;  %375 = vmatpush.msra.mxu1 %v329_v13  ;;  %v194_v18 = vld [vmem:[#allocation9 + $0x308] sm:$0xff]  ;;  %415 = vmatpush.msra.mxu3 %v330_v15  ;;  %v348_v11 = vld [vmem:[#allocation9 + $0x7d8] sm:$0xff]  ;;  %s837_s17 = sshll.u32 (%p88_p0), %s1310_s3, 4  ;;  %s1175_s18 = smov (%p88_p0), [#allocation10]   ;;  %s838_s17 = int_to_ptr.hbm [resolvable:$true] %s837_s17 }
  0x19   : > { %v321_v17 = vld [vmem:[#allocation9 + $0x700] sm:$0xff]  ;;  %v322_v19 = vld [vmem:[#allocation9 + $0x708] sm:$0xff]  ;;  %356 = vmatpush.msra.mxu0 %v193_v16  ;;  %396 = vmatpush.msra.mxu2 %v194_v18  ;;  %v211_v12 = vld [vmem:[#allocation9 + $0x390] sm:$0xff]  ;;  %s835_s19 = sshll.u32 (%p88_p0), %s1175_s18, 4  ;;  %s1176_s20 = smov (%p88_p0), 128   ;;  %s836_s19 = int_to_ptr.vmem [resolvable:$true] %s835_s19 }
  0x1a   : > { %v185_v20 = vld [vmem:[#allocation9 + $0x2c0] sm:$0xff]  ;;  %376 = vmatpush.msra.mxu1 %v321_v17  ;;  %v186_v22 = vld [vmem:[#allocation9 + $0x2c8] sm:$0xff]  ;;  %416 = vmatpush.msra.mxu3 %v322_v19  ;;  %v339_v13 = vld [vmem:[#allocation9 + $0x790] sm:$0xff]  ;;  %s1177_s21 = smov (%p88_p0), 8   ;;  %s1178_s22 = smov (%p88_p0), [#allocation11]  }
  0x1b   : > { %v313_v21 = vld [vmem:[#allocation9 + $0x6c0] sm:$0xff]  ;;  %v314_v23 = vld [vmem:[#allocation9 + $0x6c8] sm:$0xff]  ;;  %357 = vmatpush.msra.mxu0 %v185_v20  ;;  %397 = vmatpush.msra.mxu2 %v186_v22  ;;  %v212_v14 = vld [vmem:[#allocation9 + $0x398] sm:$0xff]  ;;  %s852_s23 = sshll.u32 (%p88_p0), %s1178_s22, 4  ;;  %s854_s26 = sshll.u32 (%p88_p0), %s1311_s4, 4  ;;  %s853_s23 = int_to_ptr.vmem [resolvable:$true] %s852_s23  ;;  %s855_s26 = int_to_ptr.hbm [resolvable:$true] %s854_s26 }
  0x1c   : > { %v177_v24 = vld [vmem:[#allocation9 + $0x280] sm:$0xff]  ;;  %377 = vmatpush.msra.mxu1 %v313_v21  ;;  %v178_v26 = vld [vmem:[#allocation9 + $0x288] sm:$0xff]  ;;  %417 = vmatpush.msra.mxu3 %v314_v23  ;;  %v340_v15 = vld [vmem:[#allocation9 + $0x798] sm:$0xff] }
  0x1d   : > { %v305_v25 = vld [vmem:[#allocation9 + $0x680] sm:$0xff]  ;;  %v306_v27 = vld [vmem:[#allocation9 + $0x688] sm:$0xff]  ;;  %358 = vmatpush.msra.mxu0 %v177_v24  ;;  %398 = vmatpush.msra.mxu2 %v178_v26  ;;  %v203_v16 = vld [vmem:[#allocation9 + $0x350] sm:$0xff] }
  0x1e   : > { %v169_v28 = vld [vmem:[#allocation9 + $0x240] sm:$0xff]  ;;  %378 = vmatpush.msra.mxu1 %v305_v25  ;;  %v170_v30 = vld [vmem:[#allocation9 + $0x248] sm:$0xff]  ;;  %418 = vmatpush.msra.mxu3 %v306_v27  ;;  %v331_v17 = vld [vmem:[#allocation9 + $0x750] sm:$0xff] }
  0x1f   : > { %v297_v29 = vld [vmem:[#allocation9 + $0x640] sm:$0xff]  ;;  %v298_v31 = vld [vmem:[#allocation9 + $0x648] sm:$0xff]  ;;  %359 = vmatpush.msra.mxu0 %v169_v28  ;;  %399 = vmatpush.msra.mxu2 %v170_v30  ;;  %v204_v18 = vld [vmem:[#allocation9 + $0x358] sm:$0xff] }
  0x20   : > { %v161_v32 = vld [vmem:[#allocation9 + $0x200] sm:$0xff]  ;;  %379 = vmatpush.msra.mxu1 %v297_v29  ;;  %v162_v34 = vld [vmem:[#allocation9 + $0x208] sm:$0xff]  ;;  %419 = vmatpush.msra.mxu3 %v298_v31  ;;  %v332_v19 = vld [vmem:[#allocation9 + $0x758] sm:$0xff] }
  0x21   : > { %v289_v33 = vld [vmem:[#allocation9 + $0x600] sm:$0xff]  ;;  %v290_v35 = vld [vmem:[#allocation9 + $0x608] sm:$0xff]  ;;  %360 = vmatpush.msra.mxu0 %v161_v32  ;;  %400 = vmatpush.msra.mxu2 %v162_v34  ;;  %v195_v20 = vld [vmem:[#allocation9 + $0x310] sm:$0xff] }
  0x22   : > { %v153_v36 = vld [vmem:[#allocation9 + $0x1c0] sm:$0xff]  ;;  %380 = vmatpush.msra.mxu1 %v289_v33  ;;  %v154_v38 = vld [vmem:[#allocation9 + $0x1c8] sm:$0xff]  ;;  %420 = vmatpush.msra.mxu3 %v290_v35  ;;  %v323_v21 = vld [vmem:[#allocation9 + $0x710] sm:$0xff] }
  0x23   : > { %v281_v37 = vld [vmem:[#allocation9 + $0x5c0] sm:$0xff]  ;;  %v282_v39 = vld [vmem:[#allocation9 + $0x5c8] sm:$0xff]  ;;  %361 = vmatpush.msra.mxu0 %v153_v36  ;;  %401 = vmatpush.msra.mxu2 %v154_v38  ;;  %v196_v22 = vld [vmem:[#allocation9 + $0x318] sm:$0xff] }
  0x24   : > { %v145_v40 = vld [vmem:[#allocation9 + $0x180] sm:$0xff]  ;;  %381 = vmatpush.msra.mxu1 %v281_v37  ;;  %v146_v42 = vld [vmem:[#allocation9 + $0x188] sm:$0xff]  ;;  %421 = vmatpush.msra.mxu3 %v282_v39  ;;  %v324_v23 = vld [vmem:[#allocation9 + $0x718] sm:$0xff] }
  0x25   : > { %v273_v41 = vld [vmem:[#allocation9 + $0x580] sm:$0xff]  ;;  %v274_v43 = vld [vmem:[#allocation9 + $0x588] sm:$0xff]  ;;  %362 = vmatpush.msra.mxu0 %v145_v40  ;;  %402 = vmatpush.msra.mxu2 %v146_v42  ;;  %v187_v24 = vld [vmem:[#allocation9 + $0x2d0] sm:$0xff] }
  0x26   : > { %v137_v44 = vld [vmem:[#allocation9 + $0x140] sm:$0xff]  ;;  %382 = vmatpush.msra.mxu1 %v273_v41  ;;  %v138_v46 = vld [vmem:[#allocation9 + $0x148] sm:$0xff]  ;;  %422 = vmatpush.msra.mxu3 %v274_v43  ;;  %v315_v25 = vld [vmem:[#allocation9 + $0x6d0] sm:$0xff] }
  0x27   : > { %v265_v45 = vld [vmem:[#allocation9 + $0x540] sm:$0xff]  ;;  %v266_v47 = vld [vmem:[#allocation9 + $0x548] sm:$0xff]  ;;  %363 = vmatpush.msra.mxu0 %v137_v44  ;;  %403 = vmatpush.msra.mxu2 %v138_v46  ;;  %v188_v26 = vld [vmem:[#allocation9 + $0x2d8] sm:$0xff] }
  0x28   : > { %v129_v48 = vld [vmem:[#allocation9 + $0x100] sm:$0xff]  ;;  %383 = vmatpush.msra.mxu1 %v265_v45  ;;  %v130_v50 = vld [vmem:[#allocation9 + $0x108] sm:$0xff]  ;;  %423 = vmatpush.msra.mxu3 %v266_v47  ;;  %v316_v27 = vld [vmem:[#allocation9 + $0x6d8] sm:$0xff] }
  0x29   : > { %v257_v49 = vld [vmem:[#allocation9 + $0x500] sm:$0xff]  ;;  %v258_v51 = vld [vmem:[#allocation9 + $0x508] sm:$0xff]  ;;  %364 = vmatpush.msra.mxu0 %v129_v48  ;;  %404 = vmatpush.msra.mxu2 %v130_v50  ;;  %v179_v28 = vld [vmem:[#allocation9 + $0x290] sm:$0xff] }
  0x2a   : > { %v121_v52 = vld [vmem:[#allocation9 + $0xc0] sm:$0xff]  ;;  %384 = vmatpush.msra.mxu1 %v257_v49  ;;  %v122_v54 = vld [vmem:[#allocation9 + $0xc8] sm:$0xff]  ;;  %424 = vmatpush.msra.mxu3 %v258_v51  ;;  %v307_v29 = vld [vmem:[#allocation9 + $0x690] sm:$0xff] }
  0x2b   : > { %v249_v53 = vld [vmem:[#allocation9 + $0x4c0] sm:$0xff]  ;;  %v250_v55 = vld [vmem:[#allocation9 + $0x4c8] sm:$0xff]  ;;  %365 = vmatpush.msra.mxu0 %v121_v52  ;;  %405 = vmatpush.msra.mxu2 %v122_v54  ;;  %v180_v30 = vld [vmem:[#allocation9 + $0x298] sm:$0xff] }
  0x2c   : > { %v113_v56 = vld [vmem:[#allocation9 + $0x80] sm:$0xff]  ;;  %385 = vmatpush.msra.mxu1 %v249_v53  ;;  %v114_v58 = vld [vmem:[#allocation9 + $0x88] sm:$0xff]  ;;  %425 = vmatpush.msra.mxu3 %v250_v55  ;;  %v308_v31 = vld [vmem:[#allocation9 + $0x698] sm:$0xff] }
  0x2d   : > { %v241_v57 = vld [vmem:[#allocation9 + $0x480] sm:$0xff]  ;;  %v242_v59 = vld [vmem:[#allocation9 + $0x488] sm:$0xff]  ;;  %366 = vmatpush.msra.mxu0 %v113_v56  ;;  %406 = vmatpush.msra.mxu2 %v114_v58  ;;  %v171_v32 = vld [vmem:[#allocation9 + $0x250] sm:$0xff] }
  0x2e   : > { %v105_v60 = vld [vmem:[#allocation9 + $0x40] sm:$0xff]  ;;  %386 = vmatpush.msra.mxu1 %v241_v57  ;;  %v106_v62 = vld [vmem:[#allocation9 + $0x48] sm:$0xff]  ;;  %426 = vmatpush.msra.mxu3 %v242_v59  ;;  %v299_v33 = vld [vmem:[#allocation9 + $0x650] sm:$0xff] }
  0x2f   : > { %v233_v61 = vld [vmem:[#allocation9 + $0x440] sm:$0xff]  ;;  %v234_v63 = vld [vmem:[#allocation9 + $0x448] sm:$0xff]  ;;  %367 = vmatpush.msra.mxu0 %v105_v60  ;;  %407 = vmatpush.msra.mxu2 %v106_v62  ;;  %v172_v34 = vld [vmem:[#allocation9 + $0x258] sm:$0xff] }
  0x30   : > { %v97_v4 = vld [vmem:[#allocation9] sm:$0xff]  ;;  %387 = vmatpush.msra.mxu1 %v233_v61  ;;  %v98_v6 = vld [vmem:[#allocation9 + $0x8] sm:$0xff]  ;;  %427 = vmatpush.msra.mxu3 %v234_v63  ;;  %v300_v35 = vld [vmem:[#allocation9 + $0x658] sm:$0xff] }
  0x31   : > { %v225_v5 = vld [vmem:[#allocation9 + $0x400] sm:$0xff]  ;;  %v226_v7 = vld [vmem:[#allocation9 + $0x408] sm:$0xff]  ;;  %368 = vmatpush.msra.mxu0 %v97_v4  ;;  %408 = vmatpush.msra.mxu2 %v98_v6  ;;  %v163_v36 = vld [vmem:[#allocation9 + $0x210] sm:$0xff] }
  0x32   : > { %388 = vmatpush.msra.mxu1 %v225_v5  ;;  %428 = vmatpush.msra.mxu3 %v226_v7  ;;  %v291_v37 = vld [vmem:[#allocation9 + $0x610] sm:$0xff]  ;;  %v164_v38 = vld [vmem:[#allocation9 + $0x218] sm:$0xff] }
  0x33   : > { %433 = vmatpush.msrb.mxu0 %v219_v8  ;;  %473 = vmatpush.msrb.mxu2 %v220_v10  ;;  %v292_v39 = vld [vmem:[#allocation9 + $0x618] sm:$0xff]  ;;  %v155_v40 = vld [vmem:[#allocation9 + $0x1d0] sm:$0xff] }
  0x34   : > { %453 = vmatpush.msrb.mxu1 %v347_v9  ;;  %493 = vmatpush.msrb.mxu3 %v348_v11  ;;  %v283_v41 = vld [vmem:[#allocation9 + $0x5d0] sm:$0xff]  ;;  %v156_v42 = vld [vmem:[#allocation9 + $0x1d8] sm:$0xff] }
  0x35   : > { %434 = vmatpush.msrb.mxu0 %v211_v12  ;;  %474 = vmatpush.msrb.mxu2 %v212_v14  ;;  %v284_v43 = vld [vmem:[#allocation9 + $0x5d8] sm:$0xff]  ;;  %v147_v44 = vld [vmem:[#allocation9 + $0x190] sm:$0xff]  ;;  %v221_v12 = vld [vmem:[#allocation9 + $0x3e0] sm:$0xff] }
  0x36   : > { %454 = vmatpush.msrb.mxu1 %v339_v13  ;;  %494 = vmatpush.msrb.mxu3 %v340_v15  ;;  %v275_v45 = vld [vmem:[#allocation9 + $0x590] sm:$0xff]  ;;  %v148_v46 = vld [vmem:[#allocation9 + $0x198] sm:$0xff]  ;;  %v349_v13 = vld [vmem:[#allocation9 + $0x7e0] sm:$0xff] }
  0x37   : > { %435 = vmatpush.msrb.mxu0 %v203_v16  ;;  %475 = vmatpush.msrb.mxu2 %v204_v18  ;;  %v276_v47 = vld [vmem:[#allocation9 + $0x598] sm:$0xff]  ;;  %v139_v48 = vld [vmem:[#allocation9 + $0x150] sm:$0xff]  ;;  %v222_v14 = vld [vmem:[#allocation9 + $0x3e8] sm:$0xff] }
  0x38   : > { %455 = vmatpush.msrb.mxu1 %v331_v17  ;;  %495 = vmatpush.msrb.mxu3 %v332_v19  ;;  %v267_v49 = vld [vmem:[#allocation9 + $0x550] sm:$0xff]  ;;  %v140_v50 = vld [vmem:[#allocation9 + $0x158] sm:$0xff]  ;;  %v350_v15 = vld [vmem:[#allocation9 + $0x7e8] sm:$0xff] }
  0x39   : > { %436 = vmatpush.msrb.mxu0 %v195_v20  ;;  %476 = vmatpush.msrb.mxu2 %v196_v22  ;;  %v268_v51 = vld [vmem:[#allocation9 + $0x558] sm:$0xff]  ;;  %v131_v52 = vld [vmem:[#allocation9 + $0x110] sm:$0xff]  ;;  %v213_v16 = vld [vmem:[#allocation9 + $0x3a0] sm:$0xff] }
  0x3a   : > { %456 = vmatpush.msrb.mxu1 %v323_v21  ;;  %496 = vmatpush.msrb.mxu3 %v324_v23  ;;  %v259_v53 = vld [vmem:[#allocation9 + $0x510] sm:$0xff]  ;;  %v132_v54 = vld [vmem:[#allocation9 + $0x118] sm:$0xff]  ;;  %v341_v17 = vld [vmem:[#allocation9 + $0x7a0] sm:$0xff] }
  0x3b   : > { %437 = vmatpush.msrb.mxu0 %v187_v24  ;;  %477 = vmatpush.msrb.mxu2 %v188_v26  ;;  %v260_v55 = vld [vmem:[#allocation9 + $0x518] sm:$0xff]  ;;  %v123_v56 = vld [vmem:[#allocation9 + $0xd0] sm:$0xff]  ;;  %v214_v18 = vld [vmem:[#allocation9 + $0x3a8] sm:$0xff] }
  0x3c   : > { %457 = vmatpush.msrb.mxu1 %v315_v25  ;;  %497 = vmatpush.msrb.mxu3 %v316_v27  ;;  %v251_v57 = vld [vmem:[#allocation9 + $0x4d0] sm:$0xff]  ;;  %v124_v58 = vld [vmem:[#allocation9 + $0xd8] sm:$0xff]  ;;  %v342_v19 = vld [vmem:[#allocation9 + $0x7a8] sm:$0xff] }
  0x3d   : > { %438 = vmatpush.msrb.mxu0 %v179_v28  ;;  %478 = vmatpush.msrb.mxu2 %v180_v30  ;;  %v252_v59 = vld [vmem:[#allocation9 + $0x4d8] sm:$0xff]  ;;  %v115_v60 = vld [vmem:[#allocation9 + $0x90] sm:$0xff]  ;;  %v205_v20 = vld [vmem:[#allocation9 + $0x360] sm:$0xff] }
  0x3e   : > { %458 = vmatpush.msrb.mxu1 %v307_v29  ;;  %498 = vmatpush.msrb.mxu3 %v308_v31  ;;  %v243_v61 = vld [vmem:[#allocation9 + $0x490] sm:$0xff]  ;;  %v116_v62 = vld [vmem:[#allocation9 + $0x98] sm:$0xff]  ;;  %v333_v21 = vld [vmem:[#allocation9 + $0x760] sm:$0xff] }
  0x3f   : > { %409 = vmatmul.f32.vlgmr.msra.gmra.mxu2 %v1162_v3  ;;  %429 = vmatmul.f32.vlgmr.msra.gmra.mxu3 %v1154_v1  ;;  %v244_v63 = vld [vmem:[#allocation9 + $0x498] sm:$0xff]  ;;  %v107_v4 = vld [vmem:[#allocation9 + $0x50] sm:$0xff]  ;;  %v206_v22 = vld [vmem:[#allocation9 + $0x368] sm:$0xff] }
  0x40   : > { %439 = vmatpush.msrb.mxu0 %v171_v32  ;;  %459 = vmatpush.msrb.mxu1 %v299_v33  ;;  %v235_v5 = vld [vmem:[#allocation9 + $0x450] sm:$0xff]  ;;  %v108_v6 = vld [vmem:[#allocation9 + $0x58] sm:$0xff]  ;;  %v334_v23 = vld [vmem:[#allocation9 + $0x768] sm:$0xff] }
  0x41   : > { %479 = vmatpush.msrb.mxu2 %v172_v34  ;;  %499 = vmatpush.msrb.mxu3 %v300_v35  ;;  %v236_v7 = vld [vmem:[#allocation9 + $0x458] sm:$0xff]  ;;  %v99_v8 = vld [vmem:[#allocation9 + $0x10] sm:$0xff]  ;;  %v197_v24 = vld [vmem:[#allocation9 + $0x320] sm:$0xff] }
  0x42   : > { %440 = vmatpush.msrb.mxu0 %v163_v36  ;;  %460 = vmatpush.msrb.mxu1 %v291_v37  ;;  %v227_v9 = vld [vmem:[#allocation9 + $0x410] sm:$0xff]  ;;  %v100_v10 = vld [vmem:[#allocation9 + $0x18] sm:$0xff]  ;;  %v325_v25 = vld [vmem:[#allocation9 + $0x720] sm:$0xff] }
  0x43   : > { %480 = vmatpush.msrb.mxu2 %v164_v38  ;;  %500 = vmatpush.msrb.mxu3 %v292_v39  ;;  %v228_v11 = vld [vmem:[#allocation9 + $0x418] sm:$0xff]  ;;  %v198_v26 = vld [vmem:[#allocation9 + $0x328] sm:$0xff]  ;;  %v189_v28 = vld [vmem:[#allocation9 + $0x2e0] sm:$0xff] }
  0x44   : > { %441 = vmatpush.msrb.mxu0 %v155_v40  ;;  %461 = vmatpush.msrb.mxu1 %v283_v41  ;;  %v326_v27 = vld [vmem:[#allocation9 + $0x728] sm:$0xff]  ;;  %v317_v29 = vld [vmem:[#allocation9 + $0x6e0] sm:$0xff] }
  0x45   : > { %481 = vmatpush.msrb.mxu2 %v156_v42  ;;  %501 = vmatpush.msrb.mxu3 %v284_v43  ;;  %v190_v30 = vld [vmem:[#allocation9 + $0x2e8] sm:$0xff]  ;;  %v181_v32 = vld [vmem:[#allocation9 + $0x2a0] sm:$0xff] }
  0x46   : > { %369 = vmatmul.f32.vlgmr.msra.gmra.mxu0 %v1162_v3  ;;  %389 = vmatmul.f32.vlgmr.msra.gmra.mxu1 %v1154_v1  ;;  %v318_v31 = vld [vmem:[#allocation9 + $0x6e8] sm:$0xff]  ;;  %v309_v33 = vld [vmem:[#allocation9 + $0x6a0] sm:$0xff] }
  0x47   : > { %442 = vmatpush.msrb.mxu0 %v147_v44  ;;  %462 = vmatpush.msrb.mxu1 %v275_v45  ;;  %v182_v34 = vld [vmem:[#allocation9 + $0x2a8] sm:$0xff]  ;;  %v173_v36 = vld [vmem:[#allocation9 + $0x260] sm:$0xff] }
  0x48   : > { %482 = vmatpush.msrb.mxu2 %v148_v46  ;;  %502 = vmatpush.msrb.mxu3 %v276_v47  ;;  %v310_v35 = vld [vmem:[#allocation9 + $0x6a8] sm:$0xff]  ;;  %v301_v37 = vld [vmem:[#allocation9 + $0x660] sm:$0xff] }
  0x49   : > { %443 = vmatpush.msrb.mxu0 %v139_v48  ;;  %463 = vmatpush.msrb.mxu1 %v267_v49  ;;  %v174_v38 = vld [vmem:[#allocation9 + $0x268] sm:$0xff]  ;;  %v165_v40 = vld [vmem:[#allocation9 + $0x220] sm:$0xff] }
  0x4a   : > { %483 = vmatpush.msrb.mxu2 %v140_v50  ;;  %503 = vmatpush.msrb.mxu3 %v268_v51  ;;  %v302_v39 = vld [vmem:[#allocation9 + $0x668] sm:$0xff]  ;;  %v293_v41 = vld [vmem:[#allocation9 + $0x620] sm:$0xff] }
  0x4b   : > { %444 = vmatpush.msrb.mxu0 %v131_v52  ;;  %464 = vmatpush.msrb.mxu1 %v259_v53  ;;  %v166_v42 = vld [vmem:[#allocation9 + $0x228] sm:$0xff]  ;;  %v157_v44 = vld [vmem:[#allocation9 + $0x1e0] sm:$0xff] }
  0x4c   : > { %484 = vmatpush.msrb.mxu2 %v132_v54  ;;  %504 = vmatpush.msrb.mxu3 %v260_v55  ;;  %v294_v43 = vld [vmem:[#allocation9 + $0x628] sm:$0xff]  ;;  %v285_v45 = vld [vmem:[#allocation9 + $0x5e0] sm:$0xff] }
  0x4d   : > { %445 = vmatpush.msrb.mxu0 %v123_v56  ;;  %465 = vmatpush.msrb.mxu1 %v251_v57  ;;  %v158_v46 = vld [vmem:[#allocation9 + $0x1e8] sm:$0xff]  ;;  %v149_v48 = vld [vmem:[#allocation9 + $0x1a0] sm:$0xff] }
  0x4e   : > { %485 = vmatpush.msrb.mxu2 %v124_v58  ;;  %505 = vmatpush.msrb.mxu3 %v252_v59  ;;  %v286_v47 = vld [vmem:[#allocation9 + $0x5e8] sm:$0xff]  ;;  %v277_v49 = vld [vmem:[#allocation9 + $0x5a0] sm:$0xff] }
  0x4f   : > { %446 = vmatpush.msrb.mxu0 %v115_v60  ;;  %466 = vmatpush.msrb.mxu1 %v243_v61  ;;  %v150_v50 = vld [vmem:[#allocation9 + $0x1a8] sm:$0xff]  ;;  %v141_v52 = vld [vmem:[#allocation9 + $0x160] sm:$0xff] }
  0x50   : > { %486 = vmatpush.msrb.mxu2 %v116_v62  ;;  %506 = vmatpush.msrb.mxu3 %v244_v63  ;;  %v278_v51 = vld [vmem:[#allocation9 + $0x5a8] sm:$0xff]  ;;  %v269_v53 = vld [vmem:[#allocation9 + $0x560] sm:$0xff] }
  0x51   : > { %447 = vmatpush.msrb.mxu0 %v107_v4  ;;  %467 = vmatpush.msrb.mxu1 %v235_v5  ;;  %v142_v54 = vld [vmem:[#allocation9 + $0x168] sm:$0xff]  ;;  %v133_v56 = vld [vmem:[#allocation9 + $0x120] sm:$0xff] }
  0x52   : > { %487 = vmatpush.msrb.mxu2 %v108_v6  ;;  %507 = vmatpush.msrb.mxu3 %v236_v7  ;;  %v270_v55 = vld [vmem:[#allocation9 + $0x568] sm:$0xff]  ;;  %v261_v57 = vld [vmem:[#allocation9 + $0x520] sm:$0xff] }
  0x53   : > { %448 = vmatpush.msrb.mxu0 %v99_v8  ;;  %468 = vmatpush.msrb.mxu1 %v227_v9  ;;  %v134_v58 = vld [vmem:[#allocation9 + $0x128] sm:$0xff]  ;;  %v125_v60 = vld [vmem:[#allocation9 + $0xe0] sm:$0xff] }
  0x54   : > { %488 = vmatpush.msrb.mxu2 %v100_v10  ;;  %508 = vmatpush.msrb.mxu3 %v228_v11  ;;  %v262_v59 = vld [vmem:[#allocation9 + $0x528] sm:$0xff]  ;;  %v253_v61 = vld [vmem:[#allocation9 + $0x4e0] sm:$0xff] }
  0x55   : > { %449 = vmatmul.f32.vlgmr.msrb.gmra.mxu0 %v1162_v3  ;;  %469 = vmatmul.f32.vlgmr.msrb.gmra.mxu1 %v1154_v1  ;;  %v126_v62 = vld [vmem:[#allocation9 + $0xe8] sm:$0xff]  ;;  %v117_v4 = vld [vmem:[#allocation9 + $0xa0] sm:$0xff] }
  0x56   : > { %513 = vmatpush.msra.mxu0 %v221_v12  ;;  %533 = vmatpush.msra.mxu1 %v349_v13  ;;  %v254_v63 = vld [vmem:[#allocation9 + $0x4e8] sm:$0xff]  ;;  %v245_v5 = vld [vmem:[#allocation9 + $0x4a0] sm:$0xff] }
  0x57   : > { %553 = vmatpush.msra.mxu2 %v222_v14  ;;  %573 = vmatpush.msra.mxu3 %v350_v15  ;;  %v118_v6 = vld [vmem:[#allocation9 + $0xa8] sm:$0xff]  ;;  %v109_v8 = vld [vmem:[#allocation9 + $0x60] sm:$0xff] }
  0x58   : > { %489 = vmatmul.f32.vlgmr.msrb.gmra.mxu2 %v1162_v3  ;;  %509 = vmatmul.f32.vlgmr.msrb.gmra.mxu3 %v1154_v1  ;;  %v246_v7 = vld [vmem:[#allocation9 + $0x4a8] sm:$0xff]  ;;  %v237_v9 = vld [vmem:[#allocation9 + $0x460] sm:$0xff] }
  0x59   : > { %514 = vmatpush.msra.mxu0 %v213_v16  ;;  %534 = vmatpush.msra.mxu1 %v341_v17  ;;  %v110_v10 = vld [vmem:[#allocation9 + $0x68] sm:$0xff]  ;;  %v101_v12 = vld [vmem:[#allocation9 + $0x20] sm:$0xff]  ;;  %v223_v16 = vld [vmem:[#allocation9 + $0x3f0] sm:$0xff] }
  0x5a   : > { %554 = vmatpush.msra.mxu2 %v214_v18  ;;  %574 = vmatpush.msra.mxu3 %v342_v19  ;;  %v238_v11 = vld [vmem:[#allocation9 + $0x468] sm:$0xff]  ;;  %v229_v13 = vld [vmem:[#allocation9 + $0x420] sm:$0xff]  ;;  %v351_v17 = vld [vmem:[#allocation9 + $0x7f0] sm:$0xff] }
  0x5b   : > { %515 = vmatpush.msra.mxu0 %v205_v20  ;;  %535 = vmatpush.msra.mxu1 %v333_v21  ;;  %v102_v14 = vld [vmem:[#allocation9 + $0x28] sm:$0xff]  ;;  %v224_v18 = vld [vmem:[#allocation9 + $0x3f8] sm:$0xff]  ;;  %v215_v20 = vld [vmem:[#allocation9 + $0x3b0] sm:$0xff] }
  0x5c   : > { %555 = vmatpush.msra.mxu2 %v206_v22  ;;  %575 = vmatpush.msra.mxu3 %v334_v23  ;;  %v230_v15 = vld [vmem:[#allocation9 + $0x428] sm:$0xff]  ;;  %v352_v19 = vld [vmem:[#allocation9 + $0x7f8] sm:$0xff]  ;;  %v343_v21 = vld [vmem:[#allocation9 + $0x7b0] sm:$0xff] }
  0x5d   : > { %516 = vmatpush.msra.mxu0 %v197_v24  ;;  %536 = vmatpush.msra.mxu1 %v325_v25  ;;  %v216_v22 = vld [vmem:[#allocation9 + $0x3b8] sm:$0xff]  ;;  %v207_v24 = vld [vmem:[#allocation9 + $0x370] sm:$0xff] }
  0x5e   : > { %556 = vmatpush.msra.mxu2 %v198_v26  ;;  %576 = vmatpush.msra.mxu3 %v326_v27  ;;  %v344_v23 = vld [vmem:[#allocation9 + $0x7b8] sm:$0xff]  ;;  %v335_v25 = vld [vmem:[#allocation9 + $0x770] sm:$0xff] }
  0x5f   : > { %517 = vmatpush.msra.mxu0 %v189_v28  ;;  %537 = vmatpush.msra.mxu1 %v317_v29  ;;  %v208_v26 = vld [vmem:[#allocation9 + $0x378] sm:$0xff]  ;;  %v199_v28 = vld [vmem:[#allocation9 + $0x330] sm:$0xff] }
  0x60   : > { %557 = vmatpush.msra.mxu2 %v190_v30  ;;  %577 = vmatpush.msra.mxu3 %v318_v31  ;;  %v336_v27 = vld [vmem:[#allocation9 + $0x778] sm:$0xff]  ;;  %v327_v29 = vld [vmem:[#allocation9 + $0x730] sm:$0xff] }
  0x61   : > { %518 = vmatpush.msra.mxu0 %v181_v32  ;;  %538 = vmatpush.msra.mxu1 %v309_v33  ;;  %v200_v30 = vld [vmem:[#allocation9 + $0x338] sm:$0xff]  ;;  %v191_v32 = vld [vmem:[#allocation9 + $0x2f0] sm:$0xff] }
  0x62   : > { %558 = vmatpush.msra.mxu2 %v182_v34  ;;  %578 = vmatpush.msra.mxu3 %v310_v35  ;;  %v328_v31 = vld [vmem:[#allocation9 + $0x738] sm:$0xff]  ;;  %v319_v33 = vld [vmem:[#allocation9 + $0x6f0] sm:$0xff] }
  0x63   : > { %519 = vmatpush.msra.mxu0 %v173_v36  ;;  %539 = vmatpush.msra.mxu1 %v301_v37  ;;  %v192_v34 = vld [vmem:[#allocation9 + $0x2f8] sm:$0xff]  ;;  %v183_v36 = vld [vmem:[#allocation9 + $0x2b0] sm:$0xff] }
  0x64   : > { %559 = vmatpush.msra.mxu2 %v174_v38  ;;  %579 = vmatpush.msra.mxu3 %v302_v39  ;;  %v320_v35 = vld [vmem:[#allocation9 + $0x6f8] sm:$0xff]  ;;  %v311_v37 = vld [vmem:[#allocation9 + $0x6b0] sm:$0xff] }
  0x65   : > { %520 = vmatpush.msra.mxu0 %v165_v40  ;;  %540 = vmatpush.msra.mxu1 %v293_v41  ;;  %v184_v38 = vld [vmem:[#allocation9 + $0x2b8] sm:$0xff]  ;;  %v175_v40 = vld [vmem:[#allocation9 + $0x270] sm:$0xff] }
  0x66   : > { %560 = vmatpush.msra.mxu2 %v166_v42  ;;  %580 = vmatpush.msra.mxu3 %v294_v43  ;;  %v312_v39 = vld [vmem:[#allocation9 + $0x6b8] sm:$0xff]  ;;  %v303_v41 = vld [vmem:[#allocation9 + $0x670] sm:$0xff] }
  0x67   : > { %521 = vmatpush.msra.mxu0 %v157_v44  ;;  %541 = vmatpush.msra.mxu1 %v285_v45  ;;  %v176_v42 = vld [vmem:[#allocation9 + $0x278] sm:$0xff]  ;;  %v167_v44 = vld [vmem:[#allocation9 + $0x230] sm:$0xff] }
  0x68   : > { %561 = vmatpush.msra.mxu2 %v158_v46  ;;  %581 = vmatpush.msra.mxu3 %v286_v47  ;;  %v304_v43 = vld [vmem:[#allocation9 + $0x678] sm:$0xff]  ;;  %v295_v45 = vld [vmem:[#allocation9 + $0x630] sm:$0xff] }
  0x69   : > { %522 = vmatpush.msra.mxu0 %v149_v48  ;;  %542 = vmatpush.msra.mxu1 %v277_v49  ;;  %v168_v46 = vld [vmem:[#allocation9 + $0x238] sm:$0xff]  ;;  %v159_v48 = vld [vmem:[#allocation9 + $0x1f0] sm:$0xff] }
  0x6a   : > { %562 = vmatpush.msra.mxu2 %v150_v50  ;;  %582 = vmatpush.msra.mxu3 %v278_v51  ;;  %v296_v47 = vld [vmem:[#allocation9 + $0x638] sm:$0xff]  ;;  %v287_v49 = vld [vmem:[#allocation9 + $0x5f0] sm:$0xff] }
  0x6b   : > { %523 = vmatpush.msra.mxu0 %v141_v52  ;;  %543 = vmatpush.msra.mxu1 %v269_v53  ;;  %v160_v50 = vld [vmem:[#allocation9 + $0x1f8] sm:$0xff]  ;;  %v151_v52 = vld [vmem:[#allocation9 + $0x1b0] sm:$0xff] }
  0x6c   : > { %563 = vmatpush.msra.mxu2 %v142_v54  ;;  %583 = vmatpush.msra.mxu3 %v270_v55  ;;  %v288_v51 = vld [vmem:[#allocation9 + $0x5f8] sm:$0xff]  ;;  %v279_v53 = vld [vmem:[#allocation9 + $0x5b0] sm:$0xff] }
  0x6d   : > { %524 = vmatpush.msra.mxu0 %v133_v56  ;;  %544 = vmatpush.msra.mxu1 %v261_v57  ;;  %v152_v54 = vld [vmem:[#allocation9 + $0x1b8] sm:$0xff]  ;;  %v143_v56 = vld [vmem:[#allocation9 + $0x170] sm:$0xff] }
  0x6e   : > { %564 = vmatpush.msra.mxu2 %v134_v58  ;;  %584 = vmatpush.msra.mxu3 %v262_v59  ;;  %v280_v55 = vld [vmem:[#allocation9 + $0x5b8] sm:$0xff]  ;;  %v271_v57 = vld [vmem:[#allocation9 + $0x570] sm:$0xff] }
  0x6f   : > { %525 = vmatpush.msra.mxu0 %v125_v60  ;;  %545 = vmatpush.msra.mxu1 %v253_v61  ;;  %v144_v58 = vld [vmem:[#allocation9 + $0x178] sm:$0xff]  ;;  %v135_v60 = vld [vmem:[#allocation9 + $0x130] sm:$0xff] }
  0x70   : > { %565 = vmatpush.msra.mxu2 %v126_v62  ;;  %585 = vmatpush.msra.mxu3 %v254_v63  ;;  %v272_v59 = vld [vmem:[#allocation9 + $0x578] sm:$0xff]  ;;  %v263_v61 = vld [vmem:[#allocation9 + $0x530] sm:$0xff] }
  0x71   : > { %526 = vmatpush.msra.mxu0 %v117_v4  ;;  %546 = vmatpush.msra.mxu1 %v245_v5  ;;  %v136_v62 = vld [vmem:[#allocation9 + $0x138] sm:$0xff]  ;;  %v127_v4 = vld [vmem:[#allocation9 + $0xf0] sm:$0xff] }
  0x72   : > { %566 = vmatpush.msra.mxu2 %v118_v6  ;;  %586 = vmatpush.msra.mxu3 %v246_v7  ;;  %v264_v63 = vld [vmem:[#allocation9 + $0x538] sm:$0xff]  ;;  %v255_v5 = vld [vmem:[#allocation9 + $0x4f0] sm:$0xff] }
  0x73   : > { %527 = vmatpush.msra.mxu0 %v109_v8  ;;  %547 = vmatpush.msra.mxu1 %v237_v9  ;;  %v128_v6 = vld [vmem:[#allocation9 + $0xf8] sm:$0xff]  ;;  %v119_v8 = vld [vmem:[#allocation9 + $0xb0] sm:$0xff] }
  0x74   : > { %567 = vmatpush.msra.mxu2 %v110_v10  ;;  %587 = vmatpush.msra.mxu3 %v238_v11  ;;  %v256_v7 = vld [vmem:[#allocation9 + $0x4f8] sm:$0xff]  ;;  %v247_v9 = vld [vmem:[#allocation9 + $0x4b0] sm:$0xff] }
  0x75   : > { %528 = vmatpush.msra.mxu0 %v101_v12  ;;  %548 = vmatpush.msra.mxu1 %v229_v13  ;;  %v120_v10 = vld [vmem:[#allocation9 + $0xb8] sm:$0xff]  ;;  %v111_v12 = vld [vmem:[#allocation9 + $0x70] sm:$0xff] }
  0x76   : > { %568 = vmatpush.msra.mxu2 %v102_v14  ;;  %588 = vmatpush.msra.mxu3 %v230_v15  ;;  %v248_v11 = vld [vmem:[#allocation9 + $0x4b8] sm:$0xff]  ;;  %v239_v13 = vld [vmem:[#allocation9 + $0x470] sm:$0xff] }
  0x77   : > { %593 = vmatpush.msrb.mxu0 %v223_v16  ;;  %613 = vmatpush.msrb.mxu1 %v351_v17  ;;  %v112_v14 = vld [vmem:[#allocation9 + $0x78] sm:$0xff]  ;;  %v103_v16 = vld [vmem:[#allocation9 + $0x30] sm:$0xff] }
  0x78   : > { %633 = vmatpush.msrb.mxu2 %v224_v18  ;;  %653 = vmatpush.msrb.mxu3 %v352_v19  ;;  %v240_v15 = vld [vmem:[#allocation9 + $0x478] sm:$0xff]  ;;  %v231_v17 = vld [vmem:[#allocation9 + $0x430] sm:$0xff] }
  0x79   : > { %569 = vmatmul.f32.vlgmr.msra.gmra.mxu2 %v1162_v3  ;;  %589 = vmatmul.f32.vlgmr.msra.gmra.mxu3 %v1154_v1  ;;  %v104_v18 = vld [vmem:[#allocation9 + $0x38] sm:$0xff] }
  0x7a   : > { %594 = vmatpush.msrb.mxu0 %v215_v20  ;;  %614 = vmatpush.msrb.mxu1 %v343_v21  ;;  %v232_v19 = vld [vmem:[#allocation9 + $0x438] sm:$0xff] }
  0x7b   : > { %634 = vmatpush.msrb.mxu2 %v216_v22  ;;  %654 = vmatpush.msrb.mxu3 %v344_v23  ;;  %v677_v22 = vld [vmem:[%s1255_s7 + $0x8] sm:$0xff] }
  0x7c   : > { %595 = vmatpush.msrb.mxu0 %v207_v24  ;;  %615 = vmatpush.msrb.mxu1 %v335_v25  ;;  %v676_v25 = vld [vmem:[%s1255_s7] sm:$0xff] }
  0x7d   : > { %635 = vmatpush.msrb.mxu2 %v208_v26  ;;  %655 = vmatpush.msrb.mxu3 %v336_v27 }
  0x7e   : > { %596 = vmatpush.msrb.mxu0 %v199_v28  ;;  %616 = vmatpush.msrb.mxu1 %v327_v29 }
  0x7f   : > { %636 = vmatpush.msrb.mxu2 %v200_v30  ;;  %656 = vmatpush.msrb.mxu3 %v328_v31 }
  0x80   : > { %529 = vmatmul.f32.vlgmr.msra.gmra.mxu0 %v1162_v3  ;;  %549 = vmatmul.f32.vlgmr.msra.gmra.mxu1 %v1154_v1 }
  0x81   : > { %597 = vmatpush.msrb.mxu0 %v191_v32  ;;  %617 = vmatpush.msrb.mxu1 %v319_v33 }
  0x82   : > { %637 = vmatpush.msrb.mxu2 %v192_v34  ;;  %657 = vmatpush.msrb.mxu3 %v320_v35 }
  0x83   : > { %598 = vmatpush.msrb.mxu0 %v183_v36  ;;  %618 = vmatpush.msrb.mxu1 %v311_v37  ;;  %v678_v36 = vld [vmem:[%s1255_s7 + $0x10] sm:$0xff] }
  0x84   : > { %638 = vmatpush.msrb.mxu2 %v184_v38  ;;  %658 = vmatpush.msrb.mxu3 %v312_v39 }
  0x85   : > { %599 = vmatpush.msrb.mxu0 %v175_v40  ;;  %619 = vmatpush.msrb.mxu1 %v303_v41 }
  0x86   : > { %639 = vmatpush.msrb.mxu2 %v176_v42  ;;  %659 = vmatpush.msrb.mxu3 %v304_v43 }
  0x87   : > { %600 = vmatpush.msrb.mxu0 %v167_v44  ;;  %620 = vmatpush.msrb.mxu1 %v295_v45 }
  0x88   : > { %640 = vmatpush.msrb.mxu2 %v168_v46  ;;  %660 = vmatpush.msrb.mxu3 %v296_v47 }
  0x89   : > { %601 = vmatpush.msrb.mxu0 %v159_v48  ;;  %621 = vmatpush.msrb.mxu1 %v287_v49  ;;  %v679_v48 = vld [vmem:[%s1255_s7 + $0x18] sm:$0xff] }
  0x8a   : > { %641 = vmatpush.msrb.mxu2 %v160_v50  ;;  %661 = vmatpush.msrb.mxu3 %v288_v51 }
  0x8b   : > { %602 = vmatpush.msrb.mxu0 %v151_v52  ;;  %622 = vmatpush.msrb.mxu1 %v279_v53 }
  0x8c   : > { %642 = vmatpush.msrb.mxu2 %v152_v54  ;;  %662 = vmatpush.msrb.mxu3 %v280_v55 }
  0x8d   : > { %603 = vmatpush.msrb.mxu0 %v143_v56  ;;  %623 = vmatpush.msrb.mxu1 %v271_v57 }
  0x8e   : > { %643 = vmatpush.msrb.mxu2 %v144_v58  ;;  %663 = vmatpush.msrb.mxu3 %v272_v59 }
  0x8f   : > { %604 = vmatpush.msrb.mxu0 %v135_v60  ;;  %624 = vmatpush.msrb.mxu1 %v263_v61 }
  0x90   : > { %644 = vmatpush.msrb.mxu2 %v136_v62  ;;  %664 = vmatpush.msrb.mxu3 %v264_v63 }
  0x91   : > { %605 = vmatpush.msrb.mxu0 %v127_v4  ;;  %625 = vmatpush.msrb.mxu1 %v255_v5 }
  0x92   : > { %645 = vmatpush.msrb.mxu2 %v128_v6  ;;  %665 = vmatpush.msrb.mxu3 %v256_v7 }
  0x93   : > { %606 = vmatpush.msrb.mxu0 %v119_v8  ;;  %626 = vmatpush.msrb.mxu1 %v247_v9 }
  0x94   : > { %646 = vmatpush.msrb.mxu2 %v120_v10  ;;  %666 = vmatpush.msrb.mxu3 %v248_v11 }
  0x95   : > { %607 = vmatpush.msrb.mxu0 %v111_v12  ;;  %627 = vmatpush.msrb.mxu1 %v239_v13 }
  0x96   : > { %647 = vmatpush.msrb.mxu2 %v112_v14  ;;  %667 = vmatpush.msrb.mxu3 %v240_v15 }
  0x97   : > { %608 = vmatpush.msrb.mxu0 %v103_v16  ;;  %628 = vmatpush.msrb.mxu1 %v231_v17 }
  0x98   : > { %648 = vmatpush.msrb.mxu2 %v104_v18  ;;  %668 = vmatpush.msrb.mxu3 %v232_v19 }
  0x99   : > { %609 = vmatmul.f32.vlgmr.msrb.gmra.mxu0 %v1162_v3  ;;  %629 = vmatmul.f32.vlgmr.msrb.gmra.mxu1 %v1154_v1 }
  0x9a   : > { %649 = vmatmul.f32.vlgmr.msrb.gmra.mxu2 %v1162_v3  ;;  %669 = vmatmul.f32.vlgmr.msrb.gmra.mxu3 %v1154_v1 }
  0xc2   : > { %v410_v20 = vpop.f32.mrf.mxu2  ;;  %v430_v21 = vpop.f32.mrf.mxu3 }
  0xc3   : > { %v370_v23 = vpop.f32.mrf.mxu0  ;;  %v390_v24 = vpop.f32.mrf.mxu1  ;;  %v431_v26 = vadd.f32 %v430_v21, %v410_v20 }
  0xc4   : > { %v391_v27 = vadd.f32 %v390_v24, %v370_v23  ;;  %v688_v24 = vld [vmem:[%s1279_s12 + $0x8] sm:$0xff] }
  0xc5   : > { %v681_v28 = vadd.f32 %v677_v22, %v431_v26 }
  0xc6   : > { %v680_v29 = vadd.f32 %v676_v25, %v391_v27  ;;  %v687_v27 = vld [vmem:[%s1279_s12] sm:$0xff] }
  0xc7   : > { %v907_v30 = vmul.f32 -1.442695, %v681_v28 }
  0xc8   : > { %v906_v3 = vmul.f32 -1.442695, %v680_v29 }
  0xc9   : > { %968 = vpow2.f32 %v907_v30 }
  0xca   : > { %970 = vpow2.f32 %v906_v3 }
  0xcf   : > { %v969_v1 = vpop.eup %968 }
  0xd0   : > { %v971_v31 = vpop.eup %970  ;;  %v705_v32 = vadd.f32 1.0, %v969_v1 }
  0xd1   : > { %v704_v33 = vadd.f32 1.0, %v971_v31 }
  0xd2   : > { %972 = vrcp.f32 %v705_v32  ;;  %v450_v34 = vpop.f32.mrf.mxu0  ;;  %v470_v35 = vpop.f32.mrf.mxu1  ;;  %vm727_vm0 = vweird.f32 %v705_v32  ;;  %v733_v45 = vand.u32 2147483648, %v705_v32  ;;  %v731_v49 = vand.u32 2147483647, %v705_v32 }
  0xd3   : > { %974 = vrcp.f32 %v704_v33  ;;  %v471_v37 = vadd.f32 %v470_v35, %v450_v34  ;;  %v718_v52 = vand.u32 2147483648, %v704_v33  ;;  %vm712_vm2 = vweird.f32 %v704_v33 }
  0xd4   : > { %v716_v54 = vand.u32 2147483647, %v704_v33  ;;  %v734_v59 = vor.u32 1.1754944e-38, %v733_v45  ;;  %vm732_vm5 = vcmp.eq.f32.partialorder %v731_v49, 8.507059e+37 }
  0xd5   : > { %v682_v38 = vadd.f32 %v678_v36, %v471_v37  ;;  %v719_v63 = vor.u32 1.1754944e-38, %v718_v52  ;;  %v690_v52 = vld [vmem:[%s1279_s12 + $0x18] sm:$0xff] }
  0xd6   : > { %vm717_vm7 = vcmp.eq.f32.partialorder %v716_v54, 8.507059e+37 }
  0xd7   : > { %v908_v39 = vmul.f32 -1.442695, %v682_v38 }
  0xd8   : > { %v973_v40 = vpop.eup %972 }
  0xd9   : > { %v975_v41 = vpop.eup %974  ;;  %v723_v42 = vmul.f32 %v973_v40, %v705_v32  ;;  %976 = vpow2.f32 %v908_v39  ;;  %vm728_vm1 = vweird.f32 %v973_v40 }
  0xda   : > { %v708_v43 = vmul.f32 %v975_v41, %v704_v33  ;;  %vm713_vm3 = vweird.f32 %v975_v41  ;;  %vm1262_vm4 = vmor %vm727_vm0, %vm728_vm1 }
  0xdb   : > { %v724_v44 = vsub.f32 1.0, %v723_v42  ;;  %v490_v46 = vpop.f32.mrf.mxu2  ;;  %v510_v47 = vpop.f32.mrf.mxu3  ;;  %vm714_vm6 = vmor %vm712_vm2, %vm713_vm3 }
  0xdc   : > { %v709_v50 = vsub.f32 1.0, %v708_v43  ;;  %v511_v51 = vadd.f32 %v510_v47, %v490_v46  ;;  %v689_v43 = vld [vmem:[%s1279_s12 + $0x10] sm:$0xff] }
  0xdd   : > { %v725_v53 = vmul.f32 %v973_v40, %v724_v44 }
  0xde   : > { %v683_v56 = vadd.f32 %v679_v48, %v511_v51  ;;  %v710_v57 = vmul.f32 %v975_v41, %v709_v50 }
  0xdf   : > { %v977_v58 = vpop.eup %976  ;;  %v726_v60 = vadd.f32 %v973_v40, %v725_v53 }
  0xe0   : > { %v706_v61 = vadd.f32 1.0, %v977_v58  ;;  %v711_v62 = vadd.f32 %v975_v41, %v710_v57  ;;  %978 = vtanh.f32 %v683_v56 }
  0xe1   : > { %v730_v4 = vsel %vm1262_vm4, %v973_v40, %v726_v60 }
  0xe2   : > { %980 = vrcp.f32 %v706_v61  ;;  %v715_v5 = vsel %vm714_vm6, %v975_v41, %v711_v62  ;;  %v735_v6 = vsel %vm732_vm5, %v734_v59, %v730_v4  ;;  %v748_v13 = vand.u32 2147483648, %v706_v61 }
  0xe3   : > { %v720_v7 = vsel %vm717_vm7, %v719_v63, %v715_v5  ;;  %v811_v8 = vmul.f32 %v1158_v2, %v735_v6  ;;  %vm742_vm8 = vweird.f32 %v706_v61  ;;  %v746_v15 = vand.u32 2147483647, %v706_v61 }
  0xe4   : > { %v749_v17 = vor.u32 1.1754944e-38, %v748_v13 }
  0xe5   : > { %vm747_vm11 = vcmp.eq.f32.partialorder %v746_v15, 8.507059e+37 }
  0xe6   : > { %v979_v9 = vpop.eup %978 }
  0xe7   : > { %v812_v10 = vmul.f32 %v979_v9, %v720_v7 }
  0xe8   : > { %v981_v11 = vpop.eup %980 }
  0xe9   : > { %v738_v12 = vmul.f32 %v981_v11, %v706_v61  ;;  %v1269_v2 = vadd.f32 %v812_v10, %v811_v8   ;;  %vm743_vm9 = vweird.f32 %v981_v11 }
  0xea   : > { %vm744_vm10 = vmor %vm742_vm8, %vm743_vm9 }
  0xeb   : > { %v739_v14 = vsub.f32 1.0, %v738_v12  ;;  %982 = vtanh.f32 %v1269_v2 }
  0xed   : > { %v740_v16 = vmul.f32 %v981_v11, %v739_v14 }
  0xef   : > { %v741_v18 = vadd.f32 %v981_v11, %v740_v16 }
  0xf1   : > { %v745_v19 = vsel %vm744_vm10, %v981_v11, %v741_v18  ;;  %v983_v20 = vpop.eup %982 }
  0xf2   : > { %v750_v21 = vsel %vm747_vm11, %v749_v17, %v745_v19 }
  0xf3   : > { %v1273_v3 = vmul.f32 %v983_v20, %v750_v21  }
  0xf5   : > { %823 = vst [vmem:[%s822_s10] sm:$0xff] %v1273_v3 }
  0xf6   :  { %843 = dma.vmem_to_hbm [thread:$0]  (%p88_p0), %s836_s19, 1024, %s838_s17, [#allocation6], %s1176_s20, %s1176_s20, %s1177_s21  }
  0xfc   : > { %v570_v22 = vpop.f32.mrf.mxu2  ;;  %v590_v23 = vpop.f32.mrf.mxu3 }
  0xfd   : > { %v530_v25 = vpop.f32.mrf.mxu0  ;;  %v550_v26 = vpop.f32.mrf.mxu1  ;;  %v591_v28 = vadd.f32 %v590_v23, %v570_v22 }
  0xfe   : > { %v551_v29 = vadd.f32 %v550_v26, %v530_v25 }
  0xff   : > { %v692_v30 = vadd.f32 %v688_v24, %v591_v28 }
 0x100   : > { %v691_v1 = vadd.f32 %v687_v27, %v551_v29 }
 0x101   : > { %v910_v31 = vmul.f32 -1.442695, %v692_v30 }
 0x102   : > { %v909_v32 = vmul.f32 -1.442695, %v691_v1 }
 0x103   : > { %984 = vpow2.f32 %v910_v31 }
 0x104   : > { %986 = vpow2.f32 %v909_v32 }
 0x109   : > { %v985_v33 = vpop.eup %984 }
 0x10a   : > { %v987_v34 = vpop.eup %986  ;;  %v762_v35 = vadd.f32 1.0, %v985_v33 }
 0x10b   : > { %v761_v36 = vadd.f32 1.0, %v987_v34 }
 0x10c   : > { %988 = vrcp.f32 %v762_v35  ;;  %vm784_vm12 = vweird.f32 %v762_v35  ;;  %v790_v55 = vand.u32 2147483648, %v762_v35  ;;  %v788_v59 = vand.u32 2147483647, %v762_v35 }
 0x10d   : > { %990 = vrcp.f32 %v761_v36  ;;  %vm769_vm14 = vweird.f32 %v761_v36  ;;  %v775_v57 = vand.u32 2147483648, %v761_v36  ;;  %v773_v61 = vand.u32 2147483647, %v761_v36 }
 0x10e   : > { %v791_v63 = vor.u32 1.1754944e-38, %v790_v55  ;;  %vm789_vm2 = vcmp.eq.f32.partialorder %v788_v59, 8.507059e+37 }
 0x10f   : > { %v776_v5 = vor.u32 1.1754944e-38, %v775_v57  ;;  %vm774_vm3 = vcmp.eq.f32.partialorder %v773_v61, 8.507059e+37 }
 0x112   : > { %v989_v37 = vpop.eup %988 }
 0x113   : > { %v991_v38 = vpop.eup %990  ;;  %v780_v39 = vmul.f32 %v989_v37, %v762_v35  ;;  %vm785_vm13 = vweird.f32 %v989_v37 }
 0x114   : > { %v765_v40 = vmul.f32 %v991_v38, %v761_v36  ;;  %vm770_vm15 = vweird.f32 %v991_v38  ;;  %vm786_vm0 = vmor %vm784_vm12, %vm785_vm13 }
 0x115   : > { %v781_v45 = vsub.f32 1.0, %v780_v39  ;;  %vm771_vm1 = vmor %vm769_vm14, %vm770_vm15 }
 0x116   : > { %v610_v41 = vpop.f32.mrf.mxu0  ;;  %v630_v42 = vpop.f32.mrf.mxu1  ;;  %v766_v46 = vsub.f32 1.0, %v765_v40 }
 0x117   : > { %v631_v44 = vadd.f32 %v630_v42, %v610_v41  ;;  %v782_v49 = vmul.f32 %v989_v37, %v781_v45 }
 0x118   : > { %v767_v53 = vmul.f32 %v991_v38, %v766_v46 }
 0x119   : > { %v693_v47 = vadd.f32 %v689_v43, %v631_v44  ;;  %v783_v58 = vadd.f32 %v989_v37, %v782_v49 }
 0x11a   : > { %v768_v60 = vadd.f32 %v991_v38, %v767_v53 }
 0x11b   : > { %v911_v48 = vmul.f32 -1.442695, %v693_v47  ;;  %v787_v6 = vsel %vm786_vm0, %v989_v37, %v783_v58 }
 0x11c   : > { %v772_v7 = vsel %vm771_vm1, %v991_v38, %v768_v60  ;;  %v792_v8 = vsel %vm789_vm2, %v791_v63, %v787_v6 }
 0x11d   : > { %992 = vpow2.f32 %v911_v48  ;;  %v650_v50 = vpop.f32.mrf.mxu2  ;;  %v670_v51 = vpop.f32.mrf.mxu3  ;;  %v777_v10 = vsel %vm774_vm3, %v776_v5, %v772_v7  ;;  %v814_v12 = vmul.f32 %v1150_v0, %v792_v8 }
 0x11e   : > { %v671_v54 = vadd.f32 %v670_v51, %v650_v50 }
 0x120   : > { %v694_v56 = vadd.f32 %v690_v52, %v671_v54 }
 0x122   : > { %994 = vtanh.f32 %v694_v56 }
 0x123   : > { %v993_v62 = vpop.eup %992 }
 0x124   : > { %v763_v4 = vadd.f32 1.0, %v993_v62 }
 0x126   : > { %996 = vrcp.f32 %v763_v4  ;;  %v805_v16 = vand.u32 2147483648, %v763_v4  ;;  %v803_v18 = vand.u32 2147483647, %v763_v4  ;;  %vm799_vm5 = vweird.f32 %v763_v4 }
 0x128   : > { %v995_v9 = vpop.eup %994  ;;  %v806_v20 = vor.u32 1.1754944e-38, %v805_v16  ;;  %vm804_vm7 = vcmp.eq.f32.partialorder %v803_v18, 8.507059e+37 }
 0x129   : > { %v815_v11 = vmul.f32 %v995_v9, %v777_v10 }
 0x12b   : > { %v816_v0 = vadd.f32 %v815_v11, %v814_v12  }
 0x12c   : > { %v997_v13 = vpop.eup %996 }
 0x12d   : > { %v795_v14 = vmul.f32 %v997_v13, %v763_v4  ;;  %998 = vtanh.f32 %v816_v0  ;;  %vm800_vm4 = vweird.f32 %v997_v13 }
 0x12e   : > { %vm801_vm6 = vmor %vm799_vm5, %vm800_vm4 }
 0x12f   : > { %v796_v15 = vsub.f32 1.0, %v795_v14 }
 0x131   : > { %v797_v17 = vmul.f32 %v997_v13, %v796_v15 }
 0x133   : > { %v798_v19 = vadd.f32 %v997_v13, %v797_v17  ;;  %v999_v22 = vpop.eup %998 }
 0x135   : > { %v802_v21 = vsel %vm801_vm6, %v997_v13, %v798_v19  ;;  %90 = sbr.rel (!%p88_p0) target bundleno = 18 (0x12), region = 69 }
 0x136   : > { %v807_v23 = vsel %vm804_vm7, %v806_v20, %v802_v21 }
 0x137   : > { %v820_v1 = vmul.f32 %v999_v22, %v807_v23  }
 0x139   : > { %826 = vst [vmem:[%s825_s14] sm:$0xff] %v820_v1 }
 0x13a   :  { %860 = dma.vmem_to_hbm [thread:$0]  %s853_s23, 1024, %s855_s26, [#allocation12], %s1176_s20, %s1176_s20, %s1177_s21  }
 0x13b   :  { %1144 = dma.done.wait [#allocation6], 1024  }
 0x13c   :  { %1145 = vsyncadd [#allocation6], 4294966272 }
 0x13d   :  { %1146 = dma.done.wait [#allocation12], 1024  }
 0x13e   :  { %1147 = vsyncadd [#allocation12], 4294966272 }
 0x13f   :  { %869 = vsyncpa [#allocation5], 1 }
 0x140   :  { %870 = vsyncpa [#allocation8], 1 }
 0x141   :  { %871 = vsyncpa [#allocation6], 1 }
 0x142   :  { %872 = vsyncpa [#allocation12], 1 }

</bundles_post_ra>
